<compile_context>
chip_gen: v7x
topology: tpu7x:2x2x1
jax: 0.10.0
libtpu: 0.0.40
codegen_flags: <defaults>
</compile_context>

<pallas_src>
import functools
from typing import List

import jax
import jax.numpy as jnp
from jax import lax
from jax.experimental import pallas as pl
from jax.experimental.pallas import tpu as pltpu


def _round_up(v, m):
    return ((v + m - 1) // m) * m


def cauchy_kernel_jax(time, sigma, length_scale):
    xs = jnp.arange(time, dtype=jnp.float32)
    dm = (xs[None, :] - xs[:, None]) ** 2
    k = sigma / (dm / (length_scale ** 2) + 1.0)
    return (k + 0.001 * jnp.eye(time, dtype=jnp.float32)).astype(jnp.float32)


# ----------------------------------------------------------------------------
# Tiny (M, M) RBF Gram in plain JAX (per review: a dedicated pallas_call for an
# 8x8 Gram is pure launch overhead; the inverse is in JAX anyway).
# ----------------------------------------------------------------------------
def rbf_gram(x, y, lengthscale, variance):
    x = x.astype(jnp.float32)
    y = y.astype(jnp.float32)
    xn = jnp.sum(x * x, axis=-1, keepdims=True)
    yn = jnp.sum(y * y, axis=-1, keepdims=True)
    d2 = jnp.maximum(xn + yn.T - 2.0 * (x @ y.T), 0.0)
    return variance * jnp.exp(-0.5 * d2 / (lengthscale * lengthscale))


class RBFKernel:
    """Minimal stationary kernel object (supplies .input_dim, callable on 1 or 2 args)."""

    def __init__(self, input_dim, lengthscale=1.0, variance=1.0):
        self.input_dim = input_dim
        self.lengthscale = float(lengthscale)
        self.variance = float(variance)

    def __call__(self, a, b=None):
        b = a if b is None else b
        return rbf_gram(a, b, self.lengthscale, self.variance)


# ----------------------------------------------------------------------------
# Fused Pallas kernel, grid = (N_pad // n_tile,)  [all "parallel"]:
#   per N tile:
#     kmn = k(pf, x)                                   (M, Nt)   (MXU + VPU/EUP)
#     A   = kmm_inv @ kmn                              (M, Nt)   (MXU)
#     sig = variance - sum_m kmn*A                     (1, Nt)   stationary diag
#     mu  = qmT_cat @ A                                (IRp, Nt) (MXU)
#     term1 = sum_ir (mu - y)^2                        (S, Nt)   sublane reduce
#     g   = qs_row @ (A*A)                             (1, Nt)   (MXU)
#     out = -0.5*tau*term1 - 0.5*tau*r*g               (S, Nt)
# N is on the 128-lane axis everywhere; IR is on sublanes (padded to mult of 8).
# Padded N columns / IR rows are garbage-but-finite / exact zero and are sliced
# off (N) or contribute zero (IR) in the caller.
# ----------------------------------------------------------------------------
def _fused_body(pf_ref, xT_ref, kinv_ref, qmT_ref, qs_ref, y_ref,
                out_ref, sig_ref, *, tau, r, lengthscale, variance):
    pf = pf_ref[...]                                          # (M, Fp)
    xT = xT_ref[...]                                          # (Fp, Nt)

    pn = jnp.sum(pf * pf, axis=-1, keepdims=True)             # (M, 1)
    xn = jnp.sum(xT * xT, axis=0, keepdims=True)              # (1, Nt)  sublane reduce
    cross = jnp.dot(pf, xT, preferred_element_type=jnp.float32)   # (M, Nt)
    d2 = jnp.maximum(pn + xn - 2.0 * cross, 0.0)
    kmn = variance * jnp.exp(-0.5 * d2 / (lengthscale * lengthscale))

    A = jnp.dot(kinv_ref[...], kmn, preferred_element_type=jnp.float32)  # (M, Nt)

    # diag(knn) == variance for a stationary RBF kernel (full knn never built).
    sig_ref[...] = variance - jnp.sum(kmn * A, axis=0, keepdims=True)    # (1, Nt)

    # mu over all modes at once: (IRp, Nt) = qmT_cat @ A.
    mu = jnp.dot(qmT_ref[...], A, preferred_element_type=jnp.float32)

    diff = mu[None, :, :] - y_ref[...]                        # (S, IRp, Nt)
    term1 = jnp.sum(diff * diff, axis=1)                      # (S, Nt)

    # g over all modes: (1, Nt) = (sum_d,i,r q_S) @ (A*A)  on the MXU.
    g = jnp.dot(qs_ref[...], A * A, preferred_element_type=jnp.float32)

    out_ref[...] = (-0.5 * tau) * term1 + (-0.5 * tau * r) * g


def fused_log_prob_terms(pf, xT, kmm_inv, qmT_cat, qs_row, y_cat, *,
                         tau, r, lengthscale, variance, n_tile):
    M, Fp = pf.shape
    _, N_pad = xT.shape
    IRp = qmT_cat.shape[0]
    S = y_cat.shape[0]
    body = functools.partial(_fused_body, tau=float(tau), r=float(r),
                             lengthscale=float(lengthscale),
                             variance=float(variance))
    return pl.pallas_call(
        body,
        out_shape=(jax.ShapeDtypeStruct((S, N_pad), jnp.float32),   # data term
                   jax.ShapeDtypeStruct((1, N_pad), jnp.float32)),  # sigma_cov diag
        grid=(N_pad // n_tile,),
        in_specs=[
            pl.BlockSpec((M, Fp), lambda n: (0, 0)),          # pseudo_feature (resident)
            pl.BlockSpec((Fp, n_tile), lambda n: (0, n)),     # x^T tile (F on sublanes)
            pl.BlockSpec((M, M), lambda n: (0, 0)),           # kmm_inv (resident)
            pl.BlockSpec((IRp, M), lambda n: (0, 0)),         # q_m concat over modes
            pl.BlockSpec((1, M), lambda n: (0, 0)),           # sum of q_S over (d,i,r)
            pl.BlockSpec((S, IRp, n_tile), lambda n: (0, 0, n)),  # y concat over modes
        ],
        out_specs=(pl.BlockSpec((S, n_tile), lambda n: (0, n)),
                   pl.BlockSpec((1, n_tile), lambda n: (0, n))),
        compiler_params=pltpu.CompilerParams(
            dimension_semantics=("parallel",)),               # megacore-shardable on v7x
    )(pf, xT, kmm_inv, qmT_cat, qs_row, y_cat)


# ----------------------------------------------------------------------------
# KL term (plain JAX glue).
# TODO(synk): kl_normal_matrix_normal / kl_normal_matrix_normal_logdiag were not
#   provided in the reference source; this is a standard KL(N(loc, diag(scale^2))
#   || MatrixNormal(0, U, V)) per trailing column r as a deterministic stand-in.
# ----------------------------------------------------------------------------
def _kl_matrix_normal(loc, scale, U, V):
    I, M, _ = loc.shape
    Uinv = jnp.linalg.inv(U)
    Vinv = jnp.linalg.inv(V)
    _, logdet_U = jnp.linalg.slogdet(U)
    _, logdet_V = jnp.linalg.slogdet(V)
    var = scale ** 2
    trace_term = jnp.einsum('i,m,imr->r', jnp.diag(Uinv), jnp.diag(Vinv), var)
    maha = jnp.einsum('imr,ij,jnr,mn->r', loc, Uinv, loc, Vinv)
    logdet_q = M * logdet_U + I * logdet_V
    logdet_p = jnp.sum(jnp.log(var), axis=(0, 1))
    return 0.5 * (trace_term + maha - I * M + logdet_q - logdet_p)


# ----------------------------------------------------------------------------
# SparseMatrixGP (JAX/Pallas version)
# ----------------------------------------------------------------------------
class SparseMatrixGPJax:
    def __init__(self, kernel, shape: List[int], pseudo_num, tau, key):
        self.shape = list(shape)
        self.dim = len(shape)
        self.pseudo_num = pseudo_num
        self.feature_len = kernel.input_dim
        self.tau = float(tau)
        self.kernel = kernel

        keys = jax.random.split(key, self.dim + 1)
        self.pseudo_feature = jax.random.normal(
            keys[0], (pseudo_num, self.feature_len), jnp.float32)
        self.log_omega = []
        for d in range(self.dim):
            if d == 0:
                self.log_omega.append(cauchy_kernel_jax(shape[0], 1.005, 3.5))
            else:
                self.log_omega.append(
                    0.5 * jax.random.normal(keys[d], (shape[d],), jnp.float32))

    def log_prob(self, x, y, q_m, q_S):
        N = x.shape[0]
        S = y[0].shape[0]
        r = q_m[0].shape[-1]
        M = self.pseudo_num
        F = self.feature_len

        # kmm Gram + inverse in plain JAX (8x8 — sub-vreg work).
        # TODO(synk): matrix inverse has no Pallas primitive; done in plain JAX.
        kmm = self.kernel(self.pseudo_feature)                 # (M, M)
        kmm_inv = jnp.linalg.inv(kmm)
        kmm_inv = 0.5 * (kmm_inv + kmm_inv.T)                  # exact symmetry => lam = A*A

        # ------- layout / padding (N on lanes, IR and F on sublanes) -------
        n_tile = 128 if N <= 128 else 512
        N_pad = _round_up(N, n_tile)
        F_pad = _round_up(F, 8)

        pf_pad = jnp.pad(self.pseudo_feature.astype(jnp.float32),
                         ((0, 0), (0, F_pad - F)))                     # (M, Fp)
        xT = jnp.pad(x.astype(jnp.float32),
                     ((0, N_pad - N), (0, F_pad - F))).T               # (Fp, N_pad)

        IRs = [self.shape[d] * r for d in range(self.dim)]
        IR_tot = sum(IRs)
        IR_pad = _round_up(IR_tot, 8)

        # q_m concatenated over modes along IR, transposed to (IR_pad, M).
        qm_cat = jnp.concatenate(
            [q_m[d].astype(jnp.float32).reshape(M, IRs[d]) for d in range(self.dim)],
            axis=1)
        qmT = jnp.pad(qm_cat, ((0, 0), (0, IR_pad - IR_tot))).T        # (IR_pad, M)

        # sum_d sum_{i,r} q_S  -> (1, M) row (precomputed; no per-step DMA/reduce).
        qs_row = sum(jnp.sum(q_S[d].astype(jnp.float32), axis=(1, 2))
                     for d in range(self.dim)).reshape(1, M)

        # y re-laid out to (S, IR, N) per mode, concatenated over modes, padded.
        y_cat = jnp.concatenate(
            [jnp.transpose(y[d].astype(jnp.float32), (0, 2, 3, 1)).reshape(S, IRs[d], N)
             for d in range(self.dim)], axis=1)
        y_cat = jnp.pad(y_cat, ((0, 0), (0, IR_pad - IR_tot), (0, N_pad - N)))

        data_term, sig_diag = fused_log_prob_terms(
            pf_pad, xT, kmm_inv, qmT, qs_row, y_cat,
            tau=self.tau, r=r,
            lengthscale=self.kernel.lengthscale,
            variance=self.kernel.variance,
            n_tile=n_tile)

        logp = data_term[:, :N]                                # (S, N)
        sig = sig_diag[0, :N]                                  # (N,)

        # KL + omega trace (plain JAX; tiny, KL is an acknowledged stand-in).
        omega_trace = jnp.float32(0.0)
        kl_total = jnp.float32(0.0)
        for d in range(self.dim):
            loc_p = jnp.transpose(q_m[d], (1, 0, 2))
            scale_p = jnp.transpose(q_S[d], (1, 0, 2))
            if self.log_omega[d].ndim == 2:
                omega_trace = omega_trace + jnp.trace(self.log_omega[d])
                kl_total = kl_total + _kl_matrix_normal(
                    loc_p, scale_p, self.log_omega[d], kmm).sum()
            elif self.log_omega[d].ndim == 1:
                omega_trace = omega_trace + jnp.exp(self.log_omega[d]).sum()
                kl_total = kl_total + _kl_matrix_normal(
                    loc_p, scale_p, jnp.diag(jnp.exp(self.log_omega[d])), kmm).sum()
            else:
                raise ValueError('Invalid covariance matrix!')

        logp = logp - kl_total
        logp = logp - 0.5 * self.tau * r * sig * omega_trace
        return logp

    def forward(self, x, y, q_m, q_S):
        return self.log_prob(x, y, q_m, q_S)


# ----------------------------------------------------------------------------
# main
# ----------------------------------------------------------------------------
if __name__ == "__main__":
    key = jax.random.PRNGKey(0)
    keys = jax.random.split(key, 10)

    F = 4          # kernel.input_dim / feature_len
    M = 8          # pseudo_num
    N = 16         # number of inputs
    S = 2          # sample dim of y
    R = 3          # rank
    shape = [8, 6]  # I_0 (time, cauchy) and I_1
    dim = len(shape)

    kern = RBFKernel(input_dim=F, lengthscale=1.0, variance=1.0)
    model = SparseMatrixGPJax(kern, shape, pseudo_num=M, tau=1.0, key=keys[0])

    x = jax.random.normal(keys[1], (N, F), jnp.float32)
    y = [jax.random.normal(keys[2 + d], (S, N, shape[d], R), jnp.float32)
         for d in range(dim)]
    q_m = [jax.random.normal(keys[4 + d], (M, shape[d], R), jnp.float32)
           for d in range(dim)]
    q_S = [0.1 + jnp.abs(jax.random.normal(keys[6 + d], (M, shape[d], R), jnp.float32))
           for d in range(dim)]

    logp = model.forward(x, y, q_m, q_S)
    logp = jax.block_until_ready(logp)
    assert logp.shape == (S, N), logp.shape
    assert bool(jnp.all(jnp.isfinite(logp)))
    print("KERNEL_OK")
</pallas_src>

<mosaic_0001>
module attributes {stable_mosaic.version = 11 : i64} {
  func.func @_fused_body(%arg0: i32, %arg1: memref<8x8xf32, #tpu.memory_space<vmem>>, %arg2: memref<8x128xf32, #tpu.memory_space<vmem>>, %arg3: memref<8x8xf32, #tpu.memory_space<vmem>>, %arg4: memref<48x8xf32, #tpu.memory_space<vmem>>, %arg5: memref<1x8xf32, #tpu.memory_space<vmem>>, %arg6: memref<2x48x128xf32, #tpu.memory_space<vmem>>, %arg7: memref<2x128xf32, #tpu.memory_space<vmem>>, %arg8: memref<1x128xf32, #tpu.memory_space<vmem>>) attributes {dimension_semantics = [#tpu.dimension_semantics<parallel>], iteration_bounds = array<i64: 1>, scalar_prefetch = 0 : i64, scratch_operands = 0 : i64, tpu.core_type = #tpu.core_type<tc>, window_params = [{pipeline_mode = #tpu.pipeline_mode<synchronous>, transform_indices = @transform_0, window_bounds = array<i64: 8, 8>}, {transform_indices = @transform_1, window_bounds = array<i64: 8, 128>}, {pipeline_mode = #tpu.pipeline_mode<synchronous>, transform_indices = @transform_2, window_bounds = array<i64: 8, 8>}, {pipeline_mode = #tpu.pipeline_mode<synchronous>, transform_indices = @transform_3, window_bounds = array<i64: 48, 8>}, {pipeline_mode = #tpu.pipeline_mode<synchronous>, transform_indices = @transform_4, window_bounds = array<i64: 1, 8>}, {transform_indices = @transform_5, window_bounds = array<i64: 2, 48, 128>}, {transform_indices = @transform_6, window_bounds = array<i64: 2, 128>}, {transform_indices = @transform_7, window_bounds = array<i64: 1, 128>}]} {
    %c0 = arith.constant 0 : index
    %c0_0 = arith.constant 0 : index
    %0 = vector.load %arg1[%c0, %c0_0] : memref<8x8xf32, #tpu.memory_space<vmem>>, vector<8x8xf32>
    %c0_1 = arith.constant 0 : index
    %c0_2 = arith.constant 0 : index
    %1 = vector.load %arg2[%c0_1, %c0_2] : memref<8x128xf32, #tpu.memory_space<vmem>>, vector<8x128xf32>
    %2 = arith.mulf %0, %0 : vector<8x8xf32>
    %cst = arith.constant dense<0.000000e+00> : vector<8xf32>
    %3 = vector.multi_reduction <add>, %2, %cst [1] : vector<8x8xf32> to vector<8xf32>
    %4 = vector.shape_cast %3 : vector<8xf32> to vector<8x1xf32>
    %5 = arith.mulf %1, %1 : vector<8x128xf32>
    %cst_3 = arith.constant dense<0.000000e+00> : vector<128xf32>
    %6 = vector.multi_reduction <add>, %5, %cst_3 [0] : vector<8x128xf32> to vector<128xf32>
    %7 = vector.shape_cast %6 : vector<128xf32> to vector<1x128xf32>
    %cst_4 = arith.constant dense<0.000000e+00> : vector<8x128xf32>
    %8 = tpu.matmul %0, %1, %cst_4 {dimension_numbers = #tpu.dot_dimension_numbers<[1], [0], [0], [1], [0, 0, 1, 1], [], []>} : vector<8x8xf32>, vector<8x128xf32>, vector<8x128xf32> -> vector<8x128xf32>
    %9 = vector.broadcast %4 : vector<8x1xf32> to vector<8x128xf32>
    %10 = vector.broadcast %7 : vector<1x128xf32> to vector<8x128xf32>
    %11 = arith.addf %9, %10 : vector<8x128xf32>
    %cst_5 = arith.constant 2.000000e+00 : f32
    %12 = vector.broadcast %cst_5 : f32 to vector<8x128xf32>
    %13 = arith.mulf %12, %8 : vector<8x128xf32>
    %14 = arith.subf %11, %13 : vector<8x128xf32>
    %cst_6 = arith.constant 0.000000e+00 : f32
    %15 = vector.broadcast %cst_6 : f32 to vector<8x128xf32>
    %16 = arith.maximumf %14, %15 : vector<8x128xf32>
    %cst_7 = arith.constant -5.000000e-01 : f32
    %17 = vector.broadcast %cst_7 : f32 to vector<8x128xf32>
    %18 = arith.mulf %17, %16 : vector<8x128xf32>
    %cst_8 = arith.constant 1.000000e+00 : f32
    %19 = vector.broadcast %cst_8 : f32 to vector<8x128xf32>
    %20 = arith.divf %18, %19 : vector<8x128xf32>
    %21 = math.exp %20 : vector<8x128xf32>
    %cst_9 = arith.constant 1.000000e+00 : f32
    %22 = vector.broadcast %cst_9 : f32 to vector<8x128xf32>
    %23 = arith.mulf %22, %21 : vector<8x128xf32>
    %c0_10 = arith.constant 0 : index
    %c0_11 = arith.constant 0 : index
    %24 = vector.load %arg3[%c0_10, %c0_11] : memref<8x8xf32, #tpu.memory_space<vmem>>, vector<8x8xf32>
    %cst_12 = arith.constant dense<0.000000e+00> : vector<8x128xf32>
    %25 = tpu.matmul %24, %23, %cst_12 {dimension_numbers = #tpu.dot_dimension_numbers<[1], [0], [0], [1], [0, 0, 1, 1], [], []>} : vector<8x8xf32>, vector<8x128xf32>, vector<8x128xf32> -> vector<8x128xf32>
    %26 = arith.mulf %23, %25 : vector<8x128xf32>
    %cst_13 = arith.constant dense<0.000000e+00> : vector<128xf32>
    %27 = vector.multi_reduction <add>, %26, %cst_13 [0] : vector<8x128xf32> to vector<128xf32>
    %28 = vector.shape_cast %27 : vector<128xf32> to vector<1x128xf32>
    %cst_14 = arith.constant 1.000000e+00 : f32
    %29 = vector.broadcast %cst_14 : f32 to vector<1x128xf32>
    %30 = arith.subf %29, %28 : vector<1x128xf32>
    %c0_15 = arith.constant 0 : index
    %c0_16 = arith.constant 0 : index
    %31 = vector.load %arg8[%c0_15, %c0_16] : memref<1x128xf32, #tpu.memory_space<vmem>>, vector<1x128xf32>
    tpu.vector_store %arg8[%c0_15, %c0_16], %30 {strides = array<i32>} : memref<1x128xf32, #tpu.memory_space<vmem>>, vector<1x128xf32>,
    %c0_17 = arith.constant 0 : index
    %c0_18 = arith.constant 0 : index
    %32 = vector.load %arg4[%c0_17, %c0_18] : memref<48x8xf32, #tpu.memory_space<vmem>>, vector<48x8xf32>
    %cst_19 = arith.constant dense<0.000000e+00> : vector<48x128xf32>
    %33 = tpu.matmul %32, %25, %cst_19 {dimension_numbers = #tpu.dot_dimension_numbers<[1], [0], [0], [1], [0, 0, 1, 1], [], []>} : vector<48x8xf32>, vector<8x128xf32>, vector<48x128xf32> -> vector<48x128xf32>
    %34 = vector.shape_cast %33 : vector<48x128xf32> to vector<1x48x128xf32>
    %c0_20 = arith.constant 0 : index
    %c0_21 = arith.constant 0 : index
    %c0_22 = arith.constant 0 : index
    %35 = vector.load %arg6[%c0_20, %c0_21, %c0_22] : memref<2x48x128xf32, #tpu.memory_space<vmem>>, vector<2x48x128xf32>
    %36 = vector.broadcast %34 : vector<1x48x128xf32> to vector<2x48x128xf32>
    %37 = arith.subf %36, %35 : vector<2x48x128xf32>
    %38 = arith.mulf %37, %37 : vector<2x48x128xf32>
    %cst_23 = arith.constant dense<0.000000e+00> : vector<2x128xf32>
    %39 = vector.multi_reduction <add>, %38, %cst_23 [1] : vector<2x48x128xf32> to vector<2x128xf32>
    %c0_24 = arith.constant 0 : index
    %c0_25 = arith.constant 0 : index
    %40 = vector.load %arg5[%c0_24, %c0_25] : memref<1x8xf32, #tpu.memory_space<vmem>>, vector<1x8xf32>
    %41 = arith.mulf %25, %25 : vector<8x128xf32>
    %cst_26 = arith.constant dense<0.000000e+00> : vector<1x128xf32>
    %42 = tpu.matmul %40, %41, %cst_26 {dimension_numbers = #tpu.dot_dimension_numbers<[1], [0], [0], [1], [0, 0, 1, 1], [], []>} : vector<1x8xf32>, vector<8x128xf32>, vector<1x128xf32> -> vector<1x128xf32>
    %cst_27 = arith.constant -5.000000e-01 : f32
    %43 = vector.broadcast %cst_27 : f32 to vector<2x128xf32>
    %44 = arith.mulf %43, %39 : vector<2x128xf32>
    %cst_28 = arith.constant -1.500000e+00 : f32
    %45 = vector.broadcast %cst_28 : f32 to vector<1x128xf32>
    %46 = arith.mulf %45, %42 : vector<1x128xf32>
    %47 = vector.broadcast %46 : vector<1x128xf32> to vector<2x128xf32>
    %48 = arith.addf %44, %47 : vector<2x128xf32>
    %c0_29 = arith.constant 0 : index
    %c0_30 = arith.constant 0 : index
    %49 = vector.load %arg7[%c0_29, %c0_30] : memref<2x128xf32, #tpu.memory_space<vmem>>, vector<2x128xf32>
    tpu.vector_store %arg7[%c0_29, %c0_30], %48 {strides = array<i32>} : memref<2x128xf32, #tpu.memory_space<vmem>>, vector<2x128xf32>,
    return
  }
  func.func @transform_0(%arg0: i32) -> (i32, i32) {
    %c0_i32 = arith.constant 0 : i32
    %c0_i32_0 = arith.constant 0 : i32
    %c0_i32_1 = arith.constant 0 : i32
    return %c0_i32, %c0_i32_0 : i32, i32
  }
  func.func @transform_1(%arg0: i32) -> (i32, i32) {
    %c0_i32 = arith.constant 0 : i32
    %c0_i32_0 = arith.constant 0 : i32
    return %c0_i32, %arg0 : i32, i32
  }
  func.func @transform_2(%arg0: i32) -> (i32, i32) {
    %c0_i32 = arith.constant 0 : i32
    %c0_i32_0 = arith.constant 0 : i32
    %c0_i32_1 = arith.constant 0 : i32
    return %c0_i32, %c0_i32_0 : i32, i32
  }
  func.func @transform_3(%arg0: i32) -> (i32, i32) {
    %c0_i32 = arith.constant 0 : i32
    %c0_i32_0 = arith.constant 0 : i32
    %c0_i32_1 = arith.constant 0 : i32
    return %c0_i32, %c0_i32_0 : i32, i32
  }
  func.func @transform_4(%arg0: i32) -> (i32, i32) {
    %c0_i32 = arith.constant 0 : i32
    %c0_i32_0 = arith.constant 0 : i32
    %c0_i32_1 = arith.constant 0 : i32
    return %c0_i32, %c0_i32_0 : i32, i32
  }
  func.func @transform_5(%arg0: i32) -> (i32, i32, i32) {
    %c0_i32 = arith.constant 0 : i32
    %c0_i32_0 = arith.constant 0 : i32
    %c0_i32_1 = arith.constant 0 : i32
    return %c0_i32, %c0_i32_0, %arg0 : i32, i32, i32
  }
  func.func @transform_6(%arg0: i32) -> (i32, i32) {
    %c0_i32 = arith.constant 0 : i32
    %c0_i32_0 = arith.constant 0 : i32
    return %c0_i32, %arg0 : i32, i32
  }
  func.func @transform_7(%arg0: i32) -> (i32, i32) {
    %c0_i32 = arith.constant 0 : i32
    %c0_i32_0 = arith.constant 0 : i32
    return %c0_i32, %arg0 : i32, i32
  }
}

</mosaic_0001>

<bundles_post_ra>
// kernel: tpu_custom_call.1
= control target key start
LH: loop header
LB: loop body
LE: loop exit
PB: predicated region body
PF: predicated region fallthrough
CT: control target
= control target key end

     0   :  { %13 = vsyncpa [#allocation3], 0  ;;  %s770_s0 = inlined_call_operand.vmem [shape: f32[8,8], index: 0, kind: input, shape index: {}]   ;;  %s771_s1 = inlined_call_operand.vmem [shape: f32[8,128], index: 1, kind: input, shape index: {}]   ;;  %s772_s2 = inlined_call_operand.vmem [shape: f32[8,8], index: 2, kind: input, shape index: {}]   ;;  %s773_s3 = inlined_call_operand.vmem [shape: f32[48,8], index: 3, kind: input, shape index: {}]   ;;  %s774_s4 = inlined_call_operand.vmem [shape: f32[1,8], index: 4, kind: input, shape index: {}]   ;;  %s775_s5 = inlined_call_operand.hbm [shape: f32[2,48,128], index: 5, kind: input, shape index: {}]   ;;  %s776_s6 = inlined_call_operand.hbm [shape: f32[2,128], index: 6, kind: output, shape index: {0}]   ;;  %s777_s7 = inlined_call_operand.hbm [shape: f32[1,128], index: 7, kind: output, shape index: {1}]  }
   0x1   :  { %14 = vsyncpa [#allocation4], 0 }
   0x2   :  { %15 = vsyncpa [#allocation7], 0  ;;  %s644_s24 = smov [#allocation2]   ;;  %s572_s28 = scalar_lea.hbm %s775_s5, 1536 }
   0x3   :  { %s31_s25 = sshll.u32 %s644_s24, 4  ;;  %p573_p0 = scmp.ne.s32.totalorder %s775_s5, %s572_s28  ;;  %s32_s25 = int_to_ptr.vmem [resolvable:$true] %s31_s25 }
   0x4   :  { %p576_p1 = scmp.lt.u32.totalorder %s572_s28, %s775_s5 }
   0x6   :  { %p578_p2 = pnand %p576_p1, %p573_p0 }
   0x8   :  { %581 = shalt.err (!%p578_p2)
}
   0x9   :  { %s582_s10 = scalar_lea.vmem %s32_s25, 1536  ;;  %p587_p4 = scmp.lt.s32.totalorder %s32_s25, %s32_s25 }
   0xa   :  { %p583_p3 = scmp.ne.s32.totalorder %s32_s25, %s582_s10  ;;  %p588_p5 = scmp.lt.s32.totalorder %s582_s10, %s582_s10 }
   0xc   :  { %p589_p6 = por %p588_p5, %p587_p4 }
   0xe   :  { %p590_p7 = pnand %p589_p6, %p583_p3 }
  0x10   :  { %593 = shalt.err (!%p590_p7)
}
  0x11   :  { %s645_s11 = smov 128   ;;  %s646_s12 = smov 8  }
  0x12   :  { %37 = dma.hbm_to_vmem [thread:$0]  %s775_s5, 1536, %s32_s25, [#allocation3], %s645_s11, %s645_s11, %s646_s12  }
  0x13   :  { %638 = dma.done.wait [#allocation3], 1536  }
  0x14   :  { %639 = vsyncadd [#allocation3], 4294965760  ;;  %v647_v0 = vmov 0.0   ;;  %vm648_vm0 = vmmov 0   ;;  %vm44_vm1 = vcmask 64512   ;;  %v42_v1 = vld [vmem:[%s771_s1] sm:$0xff] }
  0x15   :  { %537 = vmatprep.subr.mxu1 %v647_v0  ;;  %539 = vmatprep.mubr.msk.f32.mxu1 %vm648_vm0, %v647_v0  ;;  %v41_v2 = vld [vmem:[%s770_s0] sm:$0xff]  ;;  %v48_v5 = vmul.f32 %v42_v1, %v42_v1  ;;  %v219_v25 = vld [vmem:[%s773_s3 + $0x8] sm:$0xff]  ;;  %v220_v29 = vld [vmem:[%s773_s3 + $0x10] sm:$0xff]  ;;  %s649_s30 = smov [#allocation6]  }
  0x16   :  { %538 = vmatpush3.msra.mxu1 %v42_v1  ;;  %v43_v3 = vmul.f32 %v41_v2, %v41_v2  ;;  %v135_v21 = vld [vmem:[%s772_s2] sm:$0xff]  ;;  %v221_v32 = vld [vmem:[%s773_s3 + $0x18] sm:$0xff]  ;;  %v223_v36 = vld [vmem:[%s773_s3 + $0x28] sm:$0xff]  ;;  %s502_s8 = sshll.u32 %s649_s30, 4  ;;  %s503_s8 = int_to_ptr.vmem [resolvable:$true] %s502_s8 }
  0x17   :  { %540 = vmatmul.mubr.msk.f32.vlgmr.msra.gmra.mrb[0].mxu1 %vm44_vm1, %v41_v2  ;;  %542 = vmatprep.subr.mxu1 %v647_v0  ;;  %v49_v6 = vrot.slane %v48_v5, 4  ;;  %v218_v23 = vld [vmem:[%s773_s3] sm:$0xff]  ;;  %s594_s9 = scalar_lea.vmem %s503_s8, 16  ;;  %s598_s10 = scalar_lea.vmem %s503_s8, 32 }
  0x18   :  { %v45_v4 = vsel %vm44_vm1, %v43_v3, 0.0  ;;  %544 = vmatprep.mubr.msk.f32.mxu1 %vm648_vm0, %v647_v0  ;;  %549 = vmatprep.mubr.msk.f32.mxu0 %vm44_vm1, %v218_v23  ;;  %v395_v30 = vld [vmem:[%s774_s4] sm:$0x1]  ;;  %p595_p8 = scmp.ne.s32.totalorder %s503_s8, %s594_s9  ;;  %p599_p9 = scmp.lt.s32.totalorder %s503_s8, %s503_s8 }
  0x19   :  { %46 = vadd.xlane.f32.xlu0 %v45_v4  ;;  %v50_v7 = vadd.f32 %v49_v6, %v48_v5  ;;  %v222_v34 = vld [vmem:[%s773_s3 + $0x20] sm:$0xff]  ;;  %p600_p10 = scmp.lt.s32.totalorder %s598_s10, %s594_s9 }
  0x1b   :  { %v51_v8 = vrot.slane %v50_v7, 2  ;;  %p601_p11 = por %p600_p10, %p599_p9 }
  0x1d   :  { %v52_v9 = vadd.f32 %v51_v8, %v50_v7  ;;  %p602_p12 = pnand %p601_p11, %p595_p8 }
  0x1f   :  { %v53_v10 = vrot.slane %v52_v9, 1 }
  0x21   :  { %v54_v11 = vadd.f32 %v53_v10, %v52_v9 }
  0xa6   :  { %v47_v12 = vpop.xlane.xlu0 %46 }
  0xa7   :  { %v128_v13 = vadd.f32 %v54_v11, %v47_v12 }
  0xea   :  { %v124_v14 = vpop.f32.mrb[0].mxu1 }
  0xeb   :  { %v129_v15 = vmul.f32 2.0, %v124_v14  ;;  %v541_v16 = vpop.f32.mrb[1].mxu1 }
  0xed   :  { %v130_v17 = vsub.f32 %v128_v13, %v129_v15 }
  0xef   :  { %v131_v18 = vmax.f32 %v130_v17, 0.0 }
  0xf1   :  { %v132_v19 = vmul.f32 -0.5, %v131_v18 }
  0xf3   :  { %v133_v20 = vmul.f32 1.442695, %v132_v19 }
  0xf5   :  { %570 = vpow2.f32 %v133_v20 }
  0xff   :  { %v571_v22 = vpop.eup %570 }
 0x100   :  { %543 = vmatpush3.msra.mxu1 %v571_v22 }
 0x101   :  { %545 = vmatmul.mubr.msk.f32.vlgmr.msra.gmra.mrb[2].mxu1 %vm44_vm1, %v135_v21  ;;  %558 = vmatprep.subr.mxu1 %v647_v0 }
 0x102   :  { %560 = vmatprep.mubr.msk.f32.mxu1 %vm648_vm0, %v647_v0 }
 0x1d4   :  { %v205_v24 = vpop.f32.mrb[2].mxu1 }
 0x1d5   :  { %v209_v26 = vmul.f32 %v571_v22, %v205_v24  ;;  %v396_v27 = vmul.f32 %v205_v24, %v205_v24  ;;  %547 = vmatprep.subr.mxu0 %v205_v24  ;;  %v546_v28 = vpop.f32.mrb[3].mxu1 }
 0x1d6   :  { %548 = vmatpush3.msra.mxu0 %v205_v24 }
 0x1d7   :  { %v210_v31 = vrot.slane %v209_v26, 4  ;;  %550 = vmatmul.mubr.msk.f32.vlgmr.msra.gmra.mrb[0].mxu0 %vm44_vm1, %v219_v25  ;;  %559 = vmatpush3.msra.mxu1 %v396_v27 }
 0x1d8   :  { %552 = vmatprep.mubr.msk.f32.mxu0 %vm44_vm1, %v220_v29  ;;  %561 = vmatmul.mubr.msk.f32.vlgmr.msra.gmra.mrb[4].mxu1 %vm44_vm1, %v395_v30 }
 0x1d9   :  { %v211_v33 = vadd.f32 %v210_v31, %v209_v26 }
 0x1db   :  { %553 = vmatmul.mubr.msk.f32.gmra.mrb[2].mxu0 %vm44_vm1, %v221_v32  ;;  %v212_v35 = vrot.slane %v211_v33, 2 }
 0x1dc   :  { %555 = vmatprep.mubr.msk.f32.mxu0 %vm44_vm1, %v222_v34 }
 0x1dd   :  { %v213_v37 = vadd.f32 %v212_v35, %v211_v33 }
 0x1df   :  { %556 = vmatmul.mubr.msk.f32.gmra.mrb[4].mxu0 %vm44_vm1, %v223_v36  ;;  %v214_v38 = vrot.slane %v213_v37, 1 }
 0x1e1   :  { %v215_v39 = vadd.f32 %v214_v38, %v213_v37 }
 0x1e3   :  { %v216_v40 = vsub.f32 1.0, %v215_v39 }
 0x1e5   :  { %217 = vst [vmem:[#allocation6] sm:$0x1] %v216_v40 }
 0x1e6   :  { %605 = shalt.err (!%p602_p12)
}
 0x1e7   :  { %s606_s12 = scalar_lea.hbm %s777_s7, 16 }
 0x1e8   :  { %p607_p13 = scmp.ne.s32.totalorder %s777_s7, %s606_s12  ;;  %p610_p0 = scmp.lt.u32.totalorder %s606_s12, %s777_s7 }
 0x1ea   :  { %p612_p1 = pnand %p610_p0, %p607_p13 }
 0x1ec   :  { %615 = shalt.err (!%p612_p1)
}
 0x1ed   :  { %505 = dma.vmem_to_hbm [thread:$0]  %s503_s8, 16, %s777_s7, [#allocation7]   ;;  %v338_v41 = vld [vmem:[#allocation2 + $0x8] sm:$0xff]  ;;  %v344_v42 = vld [vmem:[#allocation2 + $0x38] sm:$0xff]  ;;  %v337_v43 = vld [vmem:[#allocation2] sm:$0xff]  ;;  %v473_v31 = vlaneseq  ;;  %vm482_vm2 = vcmask 1041409  }
 0x1ee   :  { %v343_v44 = vld [vmem:[#allocation2 + $0x30] sm:$0xff]  ;;  %v340_v52 = vld [vmem:[#allocation2 + $0x18] sm:$0xff]  ;;  %v346_v53 = vld [vmem:[#allocation2 + $0x48] sm:$0xff]  ;;  %s650_s7 = smov [#allocation5]  }
 0x1ef   :  { %v339_v57 = vld [vmem:[#allocation2 + $0x10] sm:$0xff]  ;;  %v345_v58 = vld [vmem:[#allocation2 + $0x40] sm:$0xff]  ;;  %v342_v5 = vld [vmem:[#allocation2 + $0x28] sm:$0xff]  ;;  %v474_v36 = vshrl.u32 %v473_v31, 7  ;;  %s492_s0 = sshll.u32 %s650_s7, 4  ;;  %s493_s0 = int_to_ptr.vmem [resolvable:$true] %s492_s0 }
 0x1f0   :  { %v348_v6 = vld [vmem:[#allocation2 + $0x58] sm:$0xff]  ;;  %v341_v7 = vld [vmem:[#allocation2 + $0x20] sm:$0xff]  ;;  %v347_v8 = vld [vmem:[#allocation2 + $0x50] sm:$0xff]  ;;  %s616_s1 = scalar_lea.vmem %s493_s0, 32  ;;  %p621_p3 = scmp.lt.s32.totalorder %s493_s0, %s493_s0 }
 0x1f1   :  { %p617_p2 = scmp.ne.s32.totalorder %s493_s0, %s616_s1  ;;  %p622_p4 = scmp.lt.s32.totalorder %s616_s1, %s616_s1 }
 0x1f3   :  { %p623_p5 = por %p622_p4, %p621_p3 }
 0x1f5   :  { %p624_p6 = pnand %p623_p5, %p617_p2 }
 0x2aa   :  { %v551_v45 = vpop.f32.mrb[0].mxu0 }
 0x2ab   :  { %v350_v46 = vsub.f32 %v551_v45, %v338_v41  ;;  %v356_v47 = vsub.f32 %v551_v45, %v344_v42  ;;  %v308_v48 = vpop.f32.mrb[1].mxu0  ;;  %v466_v49 = vpop.f32.mrb[4].mxu1  ;;  %v475_v42 = vsub.s32 0, %v474_v36 }
 0x2ac   :  { %v349_v50 = vsub.f32 %v308_v48, %v337_v43  ;;  %v355_v51 = vsub.f32 %v308_v48, %v343_v44  ;;  %v562_v54 = vpop.f32.mrb[5].mxu1  ;;  %v472_v41 = vmul.f32 -1.5, %v466_v49 }
 0x2ad   :  { %v362_v55 = vmul.f32 %v350_v46, %v350_v46  ;;  %v368_v56 = vmul.f32 %v356_v47, %v356_v47 }
 0x2ae   :  { %v361_v59 = vmul.f32 %v349_v50, %v349_v50  ;;  %v367_v60 = vmul.f32 %v355_v51, %v355_v51  ;;  %v554_v61 = vpop.f32.mrb[2].mxu0  ;;  %v476_v47 = vrot.slane %v472_v41, %v475_v42 }
 0x2af   :  { %v352_v62 = vsub.f32 %v554_v61, %v340_v52  ;;  %v358_v63 = vsub.f32 %v554_v61, %v346_v53  ;;  %v318_v0 = vpop.f32.mrb[3].mxu0 }
 0x2b0   :  { %v373_v1 = vadd.f32 %v362_v55, %v361_v59  ;;  %v384_v2 = vadd.f32 %v368_v56, %v367_v60  ;;  %v351_v3 = vsub.f32 %v318_v0, %v339_v57  ;;  %v357_v4 = vsub.f32 %v318_v0, %v345_v58 }
 0x2b1   :  { %v364_v12 = vmul.f32 %v352_v62, %v352_v62  ;;  %v370_v13 = vmul.f32 %v358_v63, %v358_v63 }
 0x2b2   :  { %v363_v9 = vmul.f32 %v351_v3, %v351_v3  ;;  %v369_v10 = vmul.f32 %v357_v4, %v357_v4  ;;  %v557_v11 = vpop.f32.mrb[4].mxu0 }
 0x2b3   :  { %v354_v14 = vsub.f32 %v557_v11, %v342_v5  ;;  %v360_v15 = vsub.f32 %v557_v11, %v348_v6  ;;  %v328_v16 = vpop.f32.mrb[5].mxu0 }
 0x2b4   :  { %v374_v17 = vadd.f32 %v373_v1, %v363_v9  ;;  %v385_v18 = vadd.f32 %v384_v2, %v369_v10  ;;  %v353_v19 = vsub.f32 %v328_v16, %v341_v7  ;;  %v359_v20 = vsub.f32 %v328_v16, %v347_v8 }
 0x2b5   :  { %v366_v25 = vmul.f32 %v354_v14, %v354_v14  ;;  %v372_v26 = vmul.f32 %v360_v15, %v360_v15 }
 0x2b6   :  { %v365_v21 = vmul.f32 %v353_v19, %v353_v19  ;;  %v371_v22 = vmul.f32 %v359_v20, %v359_v20  ;;  %v375_v23 = vadd.f32 %v374_v17, %v364_v12  ;;  %v386_v24 = vadd.f32 %v385_v18, %v370_v13 }
 0x2b8   :  { %v376_v27 = vadd.f32 %v375_v23, %v365_v21  ;;  %v387_v28 = vadd.f32 %v386_v24, %v371_v22 }
 0x2ba   :  { %v377_v29 = vadd.f32 %v376_v27, %v366_v25  ;;  %v388_v30 = vadd.f32 %v387_v28, %v372_v26 }
 0x2bc   :  { %v378_v32 = vrot.slane %v377_v29, 4  ;;  %v389_v33 = vrot.slane %v388_v30, 4 }
 0x2be   :  { %v379_v34 = vadd.f32 %v378_v32, %v377_v29  ;;  %v390_v35 = vadd.f32 %v389_v33, %v388_v30 }
 0x2c0   :  { %v380_v37 = vrot.slane %v379_v34, 2  ;;  %v391_v38 = vrot.slane %v390_v35, 2 }
 0x2c2   :  { %v381_v39 = vadd.f32 %v380_v37, %v379_v34  ;;  %v392_v40 = vadd.f32 %v391_v38, %v390_v35 }
 0x2c4   :  { %v382_v43 = vrot.slane %v381_v39, 1  ;;  %v393_v44 = vrot.slane %v392_v40, 1 }
 0x2c6   :  { %v383_v45 = vadd.f32 %v382_v43, %v381_v39  ;;  %v394_v46 = vadd.f32 %v393_v44, %v392_v40 }
 0x2c8   :  { %v470_v48 = vmul.f32 -0.5, %v383_v45  ;;  %v471_v50 = vmul.f32 -0.5, %v394_v46 }
 0x2ca   :  { %v477_v51 = vadd.f32 %v476_v47, %v470_v48  ;;  %v478_v52 = vadd.f32 %v476_v47, %v471_v50 }
 0x2cc   :  { %v481_v53 = vrot.slane %v478_v52, 7 }
 0x2ce   :  { %v483_v54 = vsel %vm482_vm2, %v481_v53, %v477_v51 }
 0x2cf   :  { %485 = vst [vmem:[#allocation5] sm:$0x3] %v483_v54 }
 0x2d0   :  { %627 = shalt.err (!%p624_p6)
}
 0x2d1   :  { %s628_s20 = scalar_lea.hbm %s776_s6, 32 }
 0x2d2   :  { %p629_p7 = scmp.ne.s32.totalorder %s776_s6, %s628_s20  ;;  %p632_p8 = scmp.lt.u32.totalorder %s628_s20, %s776_s6 }
 0x2d4   :  { %p634_p9 = pnand %p632_p8, %p629_p7 }
 0x2d6   :  { %637 = shalt.err (!%p634_p9)
}
 0x2d7   :  { %495 = dma.vmem_to_hbm [thread:$0]  %s493_s0, 32, %s776_s6, [#allocation4]  }
 0x2d8   :  { %640 = dma.done.wait [#allocation4], 32  }
 0x2d9   :  { %641 = vsyncadd [#allocation4], 4294967264 }
 0x2da   :  { %642 = dma.done.wait [#allocation7], 16  }
 0x2db   :  { %643 = vsyncadd [#allocation7], 4294967280 }
 0x2dc   :  { %512 = vsyncpa [#allocation3], 1 }
 0x2dd   :  { %513 = vsyncpa [#allocation4], 1 }
 0x2de   :  { %514 = vsyncpa [#allocation7], 1 }

</bundles_post_ra>
